<compile_context>
chip_gen: v7x
topology: tpu7x:2x2x1
jax: 0.10.0
libtpu: 0.0.40
codegen_flags: <defaults>
</compile_context>

<pallas_src>
import functools

import jax
import jax.numpy as jnp
from jax.experimental import pallas as pl
from jax.experimental.pallas import tpu as pltpu


def _round_up(x, m):
    return ((x + m - 1) // m) * m


def _make_fused_mlp_kernel(num_layers):
    """Kernel: x_ref, (w0,b0, w1,b1, ...), o_ref. All tiles already in VMEM."""

    def kernel(x_ref, *rest):
        o_ref = rest[-1]
        wb = rest[:-1]
        # Chain of matmuls; intermediates stay in vregs/VMEM (never HBM).
        h = x_ref[...]
        for l in range(num_layers):
            w = wb[2 * l][...]          # (Din_pad, Dout_pad), pre-transposed
            b = wb[2 * l + 1][...]      # (1, Dout_pad)
            h = jnp.dot(h, w, preferred_element_type=jnp.float32) + b
        o_ref[...] = h.astype(o_ref.dtype)

    return kernel


def init_mlp_params(key, input_size, output_sizes, dtype=jnp.float32):
    """Deterministic PyTorch-style (uniform +/- 1/sqrt(fan_in)) init.

    Weights are stored PyTorch-style (out_features, in_features) so the pure
    JAX reference below matches nn.Linear exactly.
    """
    params = []
    in_size = input_size
    for out_size in output_sizes:
        key, kw, kb = jax.random.split(key, 3)
        bound = 1.0 / jnp.sqrt(jnp.asarray(in_size, dtype))
        w = jax.random.uniform(kw, (out_size, in_size), dtype, -bound, bound)
        b = jax.random.uniform(kb, (out_size,), dtype, -bound, bound)
        params.append((w, b))
        in_size = out_size
    return params


def prepare_fused_params(params):
    """Pre-transpose (out,in)->(in,out) and zero-pad feature dims to 128 lanes.

    Done ONCE, not per forward: no transpose/pad is materialized per call.
    Zero padding is exact: padded input columns are zero, padded weight
    rows/cols are zero, padded bias entries are zero, so padded output
    columns are zero and the chain stays correct layer to layer.
    """
    prepped = []
    for (w, b) in params:
        dout, din = w.shape
        din_p = _round_up(din, 128)
        dout_p = _round_up(dout, 128)
        wt = jnp.zeros((din_p, dout_p), w.dtype).at[:din, :dout].set(w.T)
        bp = jnp.zeros((1, dout_p), b.dtype).at[0, :dout].set(b)
        prepped.append((wt, bp))
    return prepped


def fused_mlp_forward(prepped_params, x, out_features):
    """Run the whole MLP in one fused Pallas kernel. Returns (B, out_features)."""
    B, Din = x.shape
    dtype = x.dtype
    num_layers = len(prepped_params)
    din_p = prepped_params[0][0].shape[0]
    dout_p = prepped_params[-1][0].shape[1]

    # Batch tiling: multiple of 8 sublanes; cap the tile at 128 rows so large
    # batches pipeline / shard across cores.
    tm = 128 if B >= 128 else _round_up(B, 8)
    b_pad = _round_up(B, tm)
    grid_m = b_pad // tm

    # Pad activations once (rows beyond B and cols beyond Din are zero).
    x_pad = jnp.zeros((b_pad, din_p), dtype).at[:B, :Din].set(x)

    kernel = _make_fused_mlp_kernel(num_layers)

    in_specs = [pl.BlockSpec((tm, din_p), lambda i: (i, 0))]
    flat_inputs = [x_pad]
    flops = 0
    bytes_accessed = x_pad.size * x_pad.dtype.itemsize
    bytes_accessed += b_pad * dout_p * jnp.dtype(dtype).itemsize
    for (wt, bp) in prepped_params:
        k_p, n_p = wt.shape
        # Constant index_map => weight/bias blocks stay resident across the
        # batch grid (fetched once, reused every tile).
        in_specs.append(pl.BlockSpec((k_p, n_p), lambda i: (0, 0)))
        in_specs.append(pl.BlockSpec((1, n_p), lambda i: (0, 0)))
        flat_inputs += [wt, bp]
        flops += 2 * b_pad * k_p * n_p
        bytes_accessed += wt.size * wt.dtype.itemsize
        bytes_accessed += bp.size * bp.dtype.itemsize

    out_specs = pl.BlockSpec((tm, dout_p), lambda i: (i, 0))

    y_pad = pl.pallas_call(
        kernel,
        out_shape=jax.ShapeDtypeStruct((b_pad, dout_p), dtype),
        grid=(grid_m,),
        in_specs=in_specs,
        out_specs=out_specs,
        compiler_params=pltpu.CompilerParams(
            dimension_semantics=("parallel",),
        ),
        cost_estimate=pl.CostEstimate(
            flops=flops, transcendentals=0, bytes_accessed=bytes_accessed),
    )(*flat_inputs)

    # Strip the padding (rows beyond B, lanes beyond the true output size).
    return y_pad[:B, :out_features]


if __name__ == "__main__":
    key = jax.random.PRNGKey(0)
    batch = 2
    input_size = 32
    output_sizes = (64, 48, 16)

    key, kx = jax.random.split(key)
    x = jax.random.normal(kx, (batch, input_size), jnp.float32)

    params = init_mlp_params(key, input_size, output_sizes)
    prepped = prepare_fused_params(params)   # one-time transpose + pad

    fwd = jax.jit(functools.partial(fused_mlp_forward, out_features=output_sizes[-1]))
    y = fwd(prepped, x)
    y = jax.block_until_ready(y)

    # Pure-JAX reference (nn.Linear chain, no activation — faithful to spec).
    ref = x
    for (w, b) in params:
        ref = ref @ w.T + b

    assert y.shape == (batch, output_sizes[-1])
    assert jnp.allclose(y, ref, atol=1e-5, rtol=1e-5), "mismatch vs reference"

    print("KERNEL_OK")
</pallas_src>

<mosaic_0001>
module attributes {stable_mosaic.version = 11 : i64} {
  func.func @kernel(%arg0: i32, %arg1: memref<8x128xf32, #tpu.memory_space<vmem>>, %arg2: memref<128x128xf32, #tpu.memory_space<vmem>>, %arg3: memref<1x128xf32, #tpu.memory_space<vmem>>, %arg4: memref<128x128xf32, #tpu.memory_space<vmem>>, %arg5: memref<1x128xf32, #tpu.memory_space<vmem>>, %arg6: memref<128x128xf32, #tpu.memory_space<vmem>>, %arg7: memref<1x128xf32, #tpu.memory_space<vmem>>, %arg8: memref<8x128xf32, #tpu.memory_space<vmem>>) attributes {dimension_semantics = [#tpu.dimension_semantics<parallel>], iteration_bounds = array<i64: 1>, scalar_prefetch = 0 : i64, scratch_operands = 0 : i64, tpu.core_type = #tpu.core_type<tc>, window_params = [{transform_indices = @transform_0, window_bounds = array<i64: 8, 128>}, {pipeline_mode = #tpu.pipeline_mode<synchronous>, transform_indices = @transform_1, window_bounds = array<i64: 128, 128>}, {pipeline_mode = #tpu.pipeline_mode<synchronous>, transform_indices = @transform_2, window_bounds = array<i64: 1, 128>}, {pipeline_mode = #tpu.pipeline_mode<synchronous>, transform_indices = @transform_3, window_bounds = array<i64: 128, 128>}, {pipeline_mode = #tpu.pipeline_mode<synchronous>, transform_indices = @transform_4, window_bounds = array<i64: 1, 128>}, {pipeline_mode = #tpu.pipeline_mode<synchronous>, transform_indices = @transform_5, window_bounds = array<i64: 128, 128>}, {pipeline_mode = #tpu.pipeline_mode<synchronous>, transform_indices = @transform_6, window_bounds = array<i64: 1, 128>}, {transform_indices = @transform_7, window_bounds = array<i64: 8, 128>}]} {
    %c0 = arith.constant 0 : index
    %c0_0 = arith.constant 0 : index
    %0 = vector.load %arg1[%c0, %c0_0] : memref<8x128xf32, #tpu.memory_space<vmem>>, vector<8x128xf32>
    %c0_1 = arith.constant 0 : index
    %c0_2 = arith.constant 0 : index
    %1 = vector.load %arg2[%c0_1, %c0_2] : memref<128x128xf32, #tpu.memory_space<vmem>>, vector<128x128xf32>
    %c0_3 = arith.constant 0 : index
    %c0_4 = arith.constant 0 : index
    %2 = vector.load %arg3[%c0_3, %c0_4] : memref<1x128xf32, #tpu.memory_space<vmem>>, vector<1x128xf32>
    %cst = arith.constant dense<0.000000e+00> : vector<8x128xf32>
    %3 = tpu.matmul %0, %1, %cst {dimension_numbers = #tpu.dot_dimension_numbers<[1], [0], [0], [1], [0, 0, 1, 1], [], []>} : vector<8x128xf32>, vector<128x128xf32>, vector<8x128xf32> -> vector<8x128xf32>
    %4 = vector.broadcast %2 : vector<1x128xf32> to vector<8x128xf32>
    %5 = arith.addf %3, %4 : vector<8x128xf32>
    %c0_5 = arith.constant 0 : index
    %c0_6 = arith.constant 0 : index
    %6 = vector.load %arg4[%c0_5, %c0_6] : memref<128x128xf32, #tpu.memory_space<vmem>>, vector<128x128xf32>
    %c0_7 = arith.constant 0 : index
    %c0_8 = arith.constant 0 : index
    %7 = vector.load %arg5[%c0_7, %c0_8] : memref<1x128xf32, #tpu.memory_space<vmem>>, vector<1x128xf32>
    %cst_9 = arith.constant dense<0.000000e+00> : vector<8x128xf32>
    %8 = tpu.matmul %5, %6, %cst_9 {dimension_numbers = #tpu.dot_dimension_numbers<[1], [0], [0], [1], [0, 0, 1, 1], [], []>} : vector<8x128xf32>, vector<128x128xf32>, vector<8x128xf32> -> vector<8x128xf32>
    %9 = vector.broadcast %7 : vector<1x128xf32> to vector<8x128xf32>
    %10 = arith.addf %8, %9 : vector<8x128xf32>
    %c0_10 = arith.constant 0 : index
    %c0_11 = arith.constant 0 : index
    %11 = vector.load %arg6[%c0_10, %c0_11] : memref<128x128xf32, #tpu.memory_space<vmem>>, vector<128x128xf32>
    %c0_12 = arith.constant 0 : index
    %c0_13 = arith.constant 0 : index
    %12 = vector.load %arg7[%c0_12, %c0_13] : memref<1x128xf32, #tpu.memory_space<vmem>>, vector<1x128xf32>
    %cst_14 = arith.constant dense<0.000000e+00> : vector<8x128xf32>
    %13 = tpu.matmul %10, %11, %cst_14 {dimension_numbers = #tpu.dot_dimension_numbers<[1], [0], [0], [1], [0, 0, 1, 1], [], []>} : vector<8x128xf32>, vector<128x128xf32>, vector<8x128xf32> -> vector<8x128xf32>
    %14 = vector.broadcast %12 : vector<1x128xf32> to vector<8x128xf32>
    %15 = arith.addf %13, %14 : vector<8x128xf32>
    %c0_15 = arith.constant 0 : index
    %c0_16 = arith.constant 0 : index
    %16 = vector.load %arg8[%c0_15, %c0_16] : memref<8x128xf32, #tpu.memory_space<vmem>>, vector<8x128xf32>
    tpu.vector_store %arg8[%c0_15, %c0_16], %15 {strides = array<i32>} : memref<8x128xf32, #tpu.memory_space<vmem>>, vector<8x128xf32>,
    return
  }
  func.func @transform_0(%arg0: i32) -> (i32, i32) {
    %c0_i32 = arith.constant 0 : i32
    %c0_i32_0 = arith.constant 0 : i32
    return %arg0, %c0_i32 : i32, i32
  }
  func.func @transform_1(%arg0: i32) -> (i32, i32) {
    %c0_i32 = arith.constant 0 : i32
    %c0_i32_0 = arith.constant 0 : i32
    %c0_i32_1 = arith.constant 0 : i32
    return %c0_i32, %c0_i32_0 : i32, i32
  }
  func.func @transform_2(%arg0: i32) -> (i32, i32) {
    %c0_i32 = arith.constant 0 : i32
    %c0_i32_0 = arith.constant 0 : i32
    %c0_i32_1 = arith.constant 0 : i32
    return %c0_i32, %c0_i32_0 : i32, i32
  }
  func.func @transform_3(%arg0: i32) -> (i32, i32) {
    %c0_i32 = arith.constant 0 : i32
    %c0_i32_0 = arith.constant 0 : i32
    %c0_i32_1 = arith.constant 0 : i32
    return %c0_i32, %c0_i32_0 : i32, i32
  }
  func.func @transform_4(%arg0: i32) -> (i32, i32) {
    %c0_i32 = arith.constant 0 : i32
    %c0_i32_0 = arith.constant 0 : i32
    %c0_i32_1 = arith.constant 0 : i32
    return %c0_i32, %c0_i32_0 : i32, i32
  }
  func.func @transform_5(%arg0: i32) -> (i32, i32) {
    %c0_i32 = arith.constant 0 : i32
    %c0_i32_0 = arith.constant 0 : i32
    %c0_i32_1 = arith.constant 0 : i32
    return %c0_i32, %c0_i32_0 : i32, i32
  }
  func.func @transform_6(%arg0: i32) -> (i32, i32) {
    %c0_i32 = arith.constant 0 : i32
    %c0_i32_0 = arith.constant 0 : i32
    %c0_i32_1 = arith.constant 0 : i32
    return %c0_i32, %c0_i32_0 : i32, i32
  }
  func.func @transform_7(%arg0: i32) -> (i32, i32) {
    %c0_i32 = arith.constant 0 : i32
    %c0_i32_0 = arith.constant 0 : i32
    return %arg0, %c0_i32 : i32, i32
  }
}

</mosaic_0001>

<bundles_post_ra>
// kernel: fused_mlp_forward.1
= control target key start
LH: loop header
LB: loop body
LE: loop exit
PB: predicated region body
PF: predicated region fallthrough
CT: control target
= control target key end

     0   :  { %12 = vsyncpa [#allocation3], 0  ;;  %s808_s0 = inlined_call_operand.vmem [shape: f32[8,128], index: 0, kind: input, shape index: {}]   ;;  %s809_s1 = inlined_call_operand.hbm [shape: f32[128,128], index: 1, kind: input, shape index: {}]   ;;  %s810_s2 = inlined_call_operand.vmem [shape: f32[1,128], index: 2, kind: input, shape index: {}]   ;;  %s811_s3 = inlined_call_operand.hbm [shape: f32[128,128], index: 3, kind: input, shape index: {}]   ;;  %s812_s4 = inlined_call_operand.vmem [shape: f32[1,128], index: 4, kind: input, shape index: {}]   ;;  %s813_s5 = inlined_call_operand.hbm [shape: f32[128,128], index: 5, kind: input, shape index: {}]   ;;  %s814_s6 = inlined_call_operand.vmem [shape: f32[1,128], index: 6, kind: input, shape index: {}]   ;;  %s815_s7 = inlined_call_operand.vmem [shape: f32[8,128], index: 7, kind: output, shape index: {}]  }
   0x1   :  { %13 = vsyncpa [#allocation5], 0  ;;  %s663_s24 = smov [#allocation4]   ;;  %s664_s26 = smov [#allocation2]  }
   0x2   :  { %s35_s25 = sshll.u32 %s663_s24, 4  ;;  %s21_s27 = sshll.u32 %s664_s26, 4  ;;  %s36_s25 = int_to_ptr.vmem [resolvable:$true] %s35_s25  ;;  %s711_s27 = int_to_ptr.vmem [resolvable:$true] %s21_s27 }
   0x3   :  { %s593_s30 = scalar_lea.hbm %s811_s3, 2048 }
   0x4   :  { %p594_p0 = scmp.ne.s32.totalorder %s811_s3, %s593_s30  ;;  %p597_p1 = scmp.lt.u32.totalorder %s593_s30, %s811_s3 }
   0x6   :  { %p599_p2 = pnand %p597_p1, %p594_p0 }
   0x8   :  { %602 = shalt.err (!%p599_p2)
}
   0x9   :  { %s603_s12 = scalar_lea.vmem %s36_s25, 2048  ;;  %p608_p4 = scmp.lt.s32.totalorder %s36_s25, %s36_s25 }
   0xa   :  { %p604_p3 = scmp.ne.s32.totalorder %s36_s25, %s603_s12  ;;  %p609_p5 = scmp.lt.s32.totalorder %s603_s12, %s603_s12 }
   0xc   :  { %p610_p6 = por %p609_p5, %p608_p4 }
   0xe   :  { %p611_p7 = pnand %p610_p6, %p604_p3 }
  0x10   :  { %614 = shalt.err (!%p611_p7)
}
  0x11   :  { %s665_s13 = smov 128   ;;  %s666_s14 = smov 8  }
  0x12   :  { %41 = dma.hbm_to_vmem [thread:$0]  %s811_s3, 2048, %s36_s25, [#allocation5], %s665_s13, %s665_s13, %s666_s14  }
  0x13   :  { %s615_s19 = scalar_lea.hbm %s809_s1, 2048 }
  0x14   :  { %p616_p8 = scmp.ne.s32.totalorder %s809_s1, %s615_s19  ;;  %p619_p9 = scmp.lt.u32.totalorder %s615_s19, %s809_s1 }
  0x16   :  { %p621_p10 = pnand %p619_p9, %p616_p8 }
  0x18   :  { %624 = shalt.err (!%p621_p10)
}
  0x19   :  { %s625_s24 = scalar_lea.vmem %s711_s27, 2048  ;;  %p630_p12 = scmp.lt.s32.totalorder %s711_s27, %s711_s27 }
  0x1a   :  { %p626_p11 = scmp.ne.s32.totalorder %s711_s27, %s625_s24  ;;  %p631_p13 = scmp.lt.s32.totalorder %s625_s24, %s625_s24 }
  0x1c   :  { %p632_p0 = por %p631_p13, %p630_p12 }
  0x1e   :  { %p633_p1 = pnand %p632_p0, %p626_p11 }
  0x20   :  { %636 = shalt.err (!%p633_p1)
}
  0x21   :  { %27 = dma.hbm_to_vmem [thread:$0]  %s809_s1, 2048, %s711_s27, [#allocation3], %s665_s13, %s665_s13, %s666_s14  }
  0x22   :  { %s667_s26 = smov [#allocation6]   ;;  %s637_s8 = scalar_lea.hbm %s813_s5, 2048 }
  0x23   :  { %s49_s28 = sshll.u32 %s667_s26, 4  ;;  %p638_p2 = scmp.ne.s32.totalorder %s813_s5, %s637_s8  ;;  %s50_s28 = int_to_ptr.vmem [resolvable:$true] %s49_s28 }
  0x24   :  { %p641_p3 = scmp.lt.u32.totalorder %s637_s8, %s813_s5 }
  0x26   :  { %p643_p4 = pnand %p641_p3, %p638_p2 }
  0x28   :  { %646 = shalt.err (!%p643_p4)
}
  0x29   :  { %s647_s15 = scalar_lea.vmem %s50_s28, 2048  ;;  %p652_p6 = scmp.lt.s32.totalorder %s50_s28, %s50_s28 }
  0x2a   :  { %p648_p5 = scmp.ne.s32.totalorder %s50_s28, %s647_s15  ;;  %p653_p7 = scmp.lt.s32.totalorder %s647_s15, %s647_s15 }
  0x2c   :  { %p654_p8 = por %p653_p7, %p652_p6 }
  0x2e   :  { %p655_p9 = pnand %p654_p8, %p648_p5 }
  0x30   :  { %658 = shalt.err (!%p655_p9)
}
  0x31   :  { %55 = dma.hbm_to_vmem [thread:$0]  %s813_s5, 2048, %s50_s28, [#allocation5], %s665_s13, %s665_s13, %s666_s14  }
  0x32   :  { %659 = dma.done.wait [#allocation3], 2048  }
  0x33   :  { %660 = vsyncadd [#allocation3], 4294965248 }
  0x34   :  { %661 = dma.done.wait [#allocation5], 4096  }
  0x35   :  { %662 = vsyncadd [#allocation5], 4294963200  ;;  %v668_v0 = vmov 0.0|0.0   ;;  %vm669_vm0 = vmmov 0   ;;  %v670_v1 = vmov 0.0   ;;  %v68_v2 = vld [vmem:[#allocation2] sm:$0xff] }
  0x36   :  { %513 = vmatprep.subr.bf16.mxu0 %v668_v0  ;;  %440 = vmatprep.mubr.msk.f32.mxu0 %vm669_vm0, %v670_v1  ;;  %v69_v3 = vld [vmem:[#allocation2 + $0x8] sm:$0xff]  ;;  %v70_v4 = vld [vmem:[#allocation2 + $0x10] sm:$0xff]  ;;  %v71_v6 = vld [vmem:[#allocation2 + $0x18] sm:$0xff] }
  0x37   :  { %537 = vmatprep.subr.bf16.mxu1 %v668_v0  ;;  %475 = vmatprep.mubr.msk.f32.mxu1 %vm669_vm0, %v670_v1  ;;  %v514_v5 = vpack.c.bf16 %v69_v3, %v68_v2  ;;  %v517_v7 = vpack.c.bf16 %v71_v6, %v70_v4  ;;  %v72_v8 = vld [vmem:[#allocation2 + $0x20] sm:$0xff]  ;;  %v73_v9 = vld [vmem:[#allocation2 + $0x28] sm:$0xff]  ;;  %v163_v12 = vld [vmem:[#allocation4 + $0x10] sm:$0xff] }
  0x38   :  { %v161_v10 = vld [vmem:[#allocation4] sm:$0xff]  ;;  %v162_v11 = vld [vmem:[#allocation4 + $0x8] sm:$0xff]  ;;  %v164_v13 = vld [vmem:[#allocation4 + $0x18] sm:$0xff]  ;;  %v520_v14 = vpack.c.bf16 %v73_v9, %v72_v8 }
  0x39   :  { %515 = vmatpush3.bf16.msra.mxu0 %v514_v5  ;;  %v538_v15 = vpack.c.bf16 %v162_v11, %v161_v10  ;;  %v74_v16 = vld [vmem:[#allocation2 + $0x30] sm:$0xff]  ;;  %v75_v17 = vld [vmem:[#allocation2 + $0x38] sm:$0xff]  ;;  %v541_v18 = vpack.c.bf16 %v164_v13, %v163_v12  ;;  %v165_v19 = vld [vmem:[#allocation4 + $0x20] sm:$0xff] }
  0x3a   :  { %516 = vmatprep.subr.bf16.mxu0 %v668_v0  ;;  %v166_v20 = vld [vmem:[#allocation4 + $0x28] sm:$0xff]  ;;  %v523_v21 = vpack.c.bf16 %v75_v17, %v74_v16  ;;  %v76_v22 = vld [vmem:[#allocation2 + $0x40] sm:$0xff]  ;;  %v167_v25 = vld [vmem:[#allocation4 + $0x30] sm:$0xff] }
  0x3b   :  { %539 = vmatpush3.bf16.msra.mxu1 %v538_v15  ;;  %v77_v23 = vld [vmem:[#allocation2 + $0x48] sm:$0xff]  ;;  %v544_v24 = vpack.c.bf16 %v166_v20, %v165_v19  ;;  %v168_v26 = vld [vmem:[#allocation4 + $0x38] sm:$0xff]  ;;  %v78_v28 = vld [vmem:[#allocation2 + $0x50] sm:$0xff] }
  0x3c   :  { %540 = vmatprep.subr.bf16.mxu1 %v668_v0  ;;  %v526_v27 = vpack.c.bf16 %v77_v23, %v76_v22  ;;  %v79_v29 = vld [vmem:[#allocation2 + $0x58] sm:$0xff]  ;;  %v547_v30 = vpack.c.bf16 %v168_v26, %v167_v25  ;;  %v169_v31 = vld [vmem:[#allocation4 + $0x40] sm:$0xff]  ;;  %v170_v32 = vld [vmem:[#allocation4 + $0x48] sm:$0xff] }
  0x3d   :  { %518 = vmatpush3.bf16.msra.mxu0 %v517_v7  ;;  %v529_v33 = vpack.c.bf16 %v79_v29, %v78_v28  ;;  %v80_v34 = vld [vmem:[#allocation2 + $0x60] sm:$0xff]  ;;  %v81_v35 = vld [vmem:[#allocation2 + $0x68] sm:$0xff]  ;;  %v550_v36 = vpack.c.bf16 %v170_v32, %v169_v31  ;;  %v171_v37 = vld [vmem:[#allocation4 + $0x50] sm:$0xff] }
  0x3e   :  { %519 = vmatprep.subr.bf16.mxu0 %v668_v0  ;;  %v172_v38 = vld [vmem:[#allocation4 + $0x58] sm:$0xff]  ;;  %v532_v39 = vpack.c.bf16 %v81_v35, %v80_v34  ;;  %v82_v40 = vld [vmem:[#allocation2 + $0x70] sm:$0xff]  ;;  %v173_v43 = vld [vmem:[#allocation4 + $0x60] sm:$0xff] }
  0x3f   :  { %542 = vmatpush3.bf16.msra.mxu1 %v541_v18  ;;  %v83_v41 = vld [vmem:[#allocation2 + $0x78] sm:$0xff]  ;;  %v553_v42 = vpack.c.bf16 %v172_v38, %v171_v37  ;;  %v174_v44 = vld [vmem:[#allocation4 + $0x68] sm:$0xff]  ;;  %v67_v47 = vld [vmem:[%s808_s0] sm:$0xff] }
  0x40   :  { %543 = vmatprep.subr.bf16.mxu1 %v668_v0  ;;  %v535_v45 = vpack.c.bf16 %v83_v41, %v82_v40  ;;  %v556_v46 = vpack.c.bf16 %v174_v44, %v173_v43  ;;  %v175_v48 = vld [vmem:[#allocation4 + $0x70] sm:$0xff]  ;;  %v176_v49 = vld [vmem:[#allocation4 + $0x78] sm:$0xff]  ;;  %v254_v51 = vld [vmem:[#allocation6] sm:$0xff] }
  0x41   :  { %521 = vmatpush3.bf16.msra.mxu0 %v520_v14  ;;  %v559_v50 = vpack.c.bf16 %v176_v49, %v175_v48  ;;  %v255_v52 = vld [vmem:[#allocation6 + $0x8] sm:$0xff]  ;;  %v256_v53 = vld [vmem:[#allocation6 + $0x10] sm:$0xff]  ;;  %v257_v55 = vld [vmem:[#allocation6 + $0x18] sm:$0xff] }
  0x42   :  { %522 = vmatprep.subr.bf16.mxu0 %v668_v0  ;;  %v562_v54 = vpack.c.bf16 %v255_v52, %v254_v51  ;;  %v565_v56 = vpack.c.bf16 %v257_v55, %v256_v53  ;;  %v258_v57 = vld [vmem:[#allocation6 + $0x20] sm:$0xff]  ;;  %v259_v58 = vld [vmem:[#allocation6 + $0x28] sm:$0xff]  ;;  %v260_v60 = vld [vmem:[#allocation6 + $0x30] sm:$0xff] }
  0x43   :  { %545 = vmatpush3.bf16.msra.mxu1 %v544_v24  ;;  %v568_v59 = vpack.c.bf16 %v259_v58, %v258_v57  ;;  %v261_v61 = vld [vmem:[#allocation6 + $0x38] sm:$0xff]  ;;  %v262_v63 = vld [vmem:[#allocation6 + $0x40] sm:$0xff]  ;;  %v264_v3 = vld [vmem:[#allocation6 + $0x50] sm:$0xff] }
  0x44   :  { %546 = vmatprep.subr.bf16.mxu1 %v668_v0  ;;  %v571_v62 = vpack.c.bf16 %v261_v61, %v260_v60  ;;  %v265_v4 = vld [vmem:[#allocation6 + $0x58] sm:$0xff]  ;;  %v266_v6 = vld [vmem:[#allocation6 + $0x60] sm:$0xff]  ;;  %v267_v7 = vld [vmem:[#allocation6 + $0x68] sm:$0xff] }
  0x45   :  { %524 = vmatpush3.bf16.msra.mxu0 %v523_v21  ;;  %v577_v5 = vpack.c.bf16 %v265_v4, %v264_v3  ;;  %v580_v8 = vpack.c.bf16 %v267_v7, %v266_v6  ;;  %v354_v9 = vld [vmem:[%s810_s2] ss:$0 sm:$0xff]  ;;  %v268_v13 = vld [vmem:[#allocation6 + $0x70] sm:$0xff]  ;;  %v269_v14 = vld [vmem:[#allocation6 + $0x78] sm:$0xff] }
  0x46   :  { %525 = vmatprep.subr.bf16.mxu0 %v668_v0  ;;  %v583_v15 = vpack.c.bf16 %v269_v14, %v268_v13  ;;  %v355_v16 = vld [vmem:[%s812_s4] ss:$0 sm:$0xff] }
  0x47   :  { %548 = vmatpush3.bf16.msra.mxu1 %v547_v30 }
  0x48   :  { %549 = vmatprep.subr.bf16.mxu1 %v668_v0 }
  0x49   :  { %527 = vmatpush3.bf16.msra.mxu0 %v526_v27 }
  0x4a   :  { %528 = vmatprep.subr.bf16.mxu0 %v668_v0 }
  0x4b   :  { %551 = vmatpush3.bf16.msra.mxu1 %v550_v36 }
  0x4c   :  { %552 = vmatprep.subr.bf16.mxu1 %v668_v0 }
  0x4d   :  { %530 = vmatpush3.bf16.msra.mxu0 %v529_v33 }
  0x4e   :  { %531 = vmatprep.subr.bf16.mxu0 %v668_v0 }
  0x4f   :  { %554 = vmatpush3.bf16.msra.mxu1 %v553_v42 }
  0x50   :  { %555 = vmatprep.subr.bf16.mxu1 %v668_v0 }
  0x51   :  { %533 = vmatpush3.bf16.msra.mxu0 %v532_v39 }
  0x52   :  { %534 = vmatprep.subr.bf16.mxu0 %v668_v0 }
  0x53   :  { %557 = vmatpush3.bf16.msra.mxu1 %v556_v46 }
  0x54   :  { %558 = vmatprep.subr.bf16.mxu1 %v668_v0 }
  0x55   :  { %536 = vmatpush3.bf16.msra.mxu0 %v535_v45 }
  0x56   :  { %561 = vmatprep.subr.bf16.mxu0 %v668_v0 }
  0x57   :  { %560 = vmatpush3.bf16.msra.mxu1 %v559_v50 }
  0x58   :  { %441 = vmatmul.mubr.f32.vlgmr.msra.gmra.mrb[0].mxu0 %v67_v47 }
  0x59   :  { %510 = vmatprep.mubr.msk.f32.mxu0 %vm669_vm0, %v670_v1  ;;  %563 = vmatpush3.bf16.msra.mxu0 %v562_v54  ;;  %v263_v1 = vld [vmem:[#allocation6 + $0x48] sm:$0xff] }
  0x5a   :  { %564 = vmatprep.subr.bf16.mxu0 %v668_v0  ;;  %v574_v2 = vpack.c.bf16 %v263_v1, %v262_v63 }
  0x5d   :  { %566 = vmatpush3.bf16.msra.mxu0 %v565_v56 }
  0x5e   :  { %567 = vmatprep.subr.bf16.mxu0 %v668_v0 }
  0x61   :  { %569 = vmatpush3.bf16.msra.mxu0 %v568_v59 }
  0x62   :  { %570 = vmatprep.subr.bf16.mxu0 %v668_v0 }
  0x65   :  { %572 = vmatpush3.bf16.msra.mxu0 %v571_v62 }
  0x66   :  { %573 = vmatprep.subr.bf16.mxu0 %v668_v0 }
  0x69   :  { %575 = vmatpush3.bf16.msra.mxu0 %v574_v2 }
  0x6a   :  { %576 = vmatprep.subr.bf16.mxu0 %v668_v0 }
  0x6d   :  { %578 = vmatpush3.bf16.msra.mxu0 %v577_v5 }
  0x6e   :  { %579 = vmatprep.subr.bf16.mxu0 %v668_v0 }
  0x71   :  { %581 = vmatpush3.bf16.msra.mxu0 %v580_v8 }
  0x72   :  { %582 = vmatprep.subr.bf16.mxu0 %v668_v0  ;;  %v356_v0 = vld [vmem:[%s814_s6] ss:$0 sm:$0xff] }
  0x75   :  { %584 = vmatpush3.bf16.msra.mxu0 %v583_v15 }
 0x12b   :  { %v157_v10 = vpop.f32.mrb[0].mxu0 }
 0x12c   :  { %v158_v11 = vadd.f32 %v354_v9, %v157_v10  ;;  %v442_v12 = vpop.f32.mrb[1].mxu0 }
 0x12e   :  { %476 = vmatmul.mubr.f32.vlgmr.msra.gmra.mrb[0].mxu1 %v158_v11 }
 0x201   :  { %v250_v17 = vpop.f32.mrb[0].mxu1 }
 0x202   :  { %v251_v18 = vadd.f32 %v355_v16, %v250_v17  ;;  %v477_v19 = vpop.f32.mrb[1].mxu1 }
 0x204   :  { %511 = vmatmul.mubr.f32.vlgmr.msra.gmra.mrb[2].mxu0 %v251_v18 }
 0x2d7   :  { %v343_v20 = vpop.f32.mrb[2].mxu0 }
 0x2d8   :  { %v344_v21 = vadd.f32 %v356_v0, %v343_v20  ;;  %v512_v22 = vpop.f32.mrb[3].mxu0 }
 0x2da   :  { %347 = vst [vmem:[%s815_s7] sm:$0xff] %v344_v21 }
 0x2db   :  { %352 = vsyncpa [#allocation3], 1 }
 0x2dc   :  { %353 = vsyncpa [#allocation5], 1 }

</bundles_post_ra>
